<compile_context>
chip_gen: v5e
topology: v5e:2x2
jax: 0.10.0
libtpu: 0.0.40
codegen_flags: <defaults>
</compile_context>

<pallas_src>
import math
import jax
import jax.numpy as jnp
from jax import lax
from jax.experimental import pallas as pl
from jax.experimental.pallas import tpu as pltpu


def _round_up(x: int, m: int) -> int:
    return (x + m - 1) // m * m


def _cdiv(a: int, b: int) -> int:
    return -(-a // b)


def _tpu_vmem_bytes() -> int:
    """Physical VMEM of the attached TPU; conservative 64 MiB fallback."""
    try:
        info = pltpu.get_tpu_info()
        v = getattr(info, "vmem_capacity_bytes", None)
        if v:
            return int(v)
    except Exception:
        pass
    return 64 << 20


def _tpu_defaults():
    """Generation-aware tiling defaults.

    128 MiB VMEM parts (v5e/v6e, 1 TensorCore): large row/vocab tiles, higher
    VMEM budget.  64 MiB parts (v7x, 2 TensorCores): tighter tiles + headroom,
    and prefer an even number of row tiles so both cores get work.
    """
    vmem = _tpu_vmem_bytes()
    if vmem >= (100 << 20):
        return dict(row_tile=768, v_tile=4096,
                    vmem_cap=int(vmem * 0.78), two_tensorcores=False)
    return dict(row_tile=512, v_tile=2048,
                vmem_cap=int(vmem * 0.78), two_tensorcores=True)


def _make_lm_head_kernel(eps: float):
    inv_sqrt2 = 1.0 / math.sqrt(2.0)

    def kernel(x_ref, wd_ref, bd_ref, gamma_ref, beta_ref, wdec_ref, bdec_ref,
               out_ref, h_ref):
        # ---- dense + GELU + LayerNorm: only once per row tile (vocab j == 0) ----
        @pl.when(pl.program_id(1) == 0)
        def _():
            # MXU matmul in the native operand dtype, f32 accumulation.
            h = jnp.dot(x_ref[...], wd_ref[...],
                        preferred_element_type=jnp.float32)
            h = h + bd_ref[...].astype(jnp.float32)
            # Exact erf GELU (matches torch.nn.functional.gelu default).
            h = 0.5 * h * (1.0 + lax.erf(h * inv_sqrt2))
            # LayerNorm over the hidden dim (f32 math).
            mu = jnp.mean(h, axis=-1, keepdims=True)
            var = jnp.mean(jnp.square(h - mu), axis=-1, keepdims=True)
            h = (h - mu) * lax.rsqrt(var + eps)
            h = h * gamma_ref[...].astype(jnp.float32) \
                + beta_ref[...].astype(jnp.float32)
            # Store once in the decoder operand dtype -> no per-step recasts.
            h_ref[...] = h.astype(h_ref.dtype)

        # ---- decoder projection for this vocab tile ----
        y = jnp.dot(h_ref[...], wdec_ref[...],
                    preferred_element_type=jnp.float32)
        y = y + bdec_ref[...].astype(jnp.float32)
        out_ref[...] = y.astype(out_ref.dtype)

    return kernel


def _estimate_vmem_bytes(row_tile, H, v_tile, in_dtype, w_dtype, out_dtype,
                         scratch_dtype, const_bufs=2):
    bi = jnp.dtype(in_dtype).itemsize
    bw = jnp.dtype(w_dtype).itemsize
    bo = jnp.dtype(out_dtype).itemsize
    bs = jnp.dtype(scratch_dtype).itemsize
    est = 2 * row_tile * H * bi                  # x rows (double buffered)
    est += const_bufs * (H * H + 3 * H) * bw     # dense W + bias + gamma + beta
    est += 2 * (H * v_tile + v_tile) * bw        # streamed decoder W / b tiles
    est += 2 * row_tile * v_tile * bo            # output tiles
    est += row_tile * H * bs                     # post-LN scratch
    return est


def prepare_params(params, *, dtype=jnp.bfloat16, v_multiple=None):
    """One-time parameter prep (outside the hot path):
      * cast the MXU operands (w_dense, w_dec) to bf16 (or `dtype`),
      * pre-pad decoder weight/bias to a vocab-tile multiple so
        roberta_lm_head never does a per-call HBM->HBM pad of the full
        decoder matrix.
    Returns (prepared_params, true_vocab_size); pass
    vocab_size=true_vocab_size to roberta_lm_head."""
    if v_multiple is None:
        v_multiple = _tpu_defaults()["v_tile"]
    assert v_multiple % 128 == 0
    V = params["w_dec"].shape[1]
    v_pad = _round_up(V, v_multiple)

    out = dict(params)
    out["w_dense"] = params["w_dense"].astype(dtype)
    w_dec = params["w_dec"]
    b_dec = params["b_dec"]
    if v_pad != V:
        w_dec = jnp.pad(w_dec, ((0, 0), (0, v_pad - V)))
        b_dec = jnp.pad(b_dec, ((0, 0), (0, v_pad - V)))
    out["w_dec"] = w_dec.astype(dtype)
    out["b_dec"] = b_dec           # biases / LN affine stay full precision
    return out, V


def roberta_lm_head(features, params, *, eps=1e-5, row_tile=None, v_tile=None,
                    vocab_size=None):
    """features: (B, S, H) -> logits: (B, S, V)."""
    B, S, H = features.shape
    N = B * S

    w_dense = params["w_dense"]
    b_dense = params["b_dense"]
    gamma = params["gamma"]
    beta = params["beta"]
    w_dec = params["w_dec"]
    b_dec = params["b_dec"]
    V_param = w_dec.shape[1]
    V_out = V_param if vocab_size is None else vocab_size

    cfg = _tpu_defaults()
    if row_tile is None:
        row_tile = cfg["row_tile"]
    if v_tile is None:
        v_tile = cfg["v_tile"]
        # f32 weights on a 64 MiB-VMEM part: halve the vocab tile.
        if cfg["two_tensorcores"] and jnp.dtype(w_dec.dtype).itemsize >= 4:
            v_tile = 1024
    assert v_tile % 128 == 0, "v_tile must be a multiple of 128"

    # Ship the activation operand in the matmul dtype (bf16 when prepared).
    compute_dtype = w_dense.dtype
    x = features.reshape(N, H)
    if x.dtype != compute_dtype:
        x = x.astype(compute_dtype)

    # ---- row tiling ----
    row_align = 8
    n_min = _round_up(N, row_align)
    row_tile = max(row_align, min(_round_up(row_tile, row_align), n_min))
    if cfg["two_tensorcores"]:
        # Prefer an even number (>=2) of row tiles so both TensorCores get work.
        nt = _cdiv(n_min, row_tile)
        if nt > 1 and nt % 2 == 1:
            row_tile = _round_up(_cdiv(n_min, nt + 1), row_align)
    n_pad = _round_up(N, row_tile)
    if n_pad != N:
        x = jnp.pad(x, ((0, n_pad - N), (0, 0)))

    # ---- vocab tiling (ideally pre-padded via prepare_params) ----
    v_pad128 = _round_up(V_param, 128)
    v_tile = min(v_tile, v_pad128)
    v_pad = _round_up(v_pad128, v_tile)
    if v_pad != V_param:
        # Fallback only: prefer prepare_params() so this per-call HBM copy of
        # the full decoder matrix never happens at V ~ 50k.
        w_dec = jnp.pad(w_dec, ((0, 0), (0, v_pad - V_param)))
        b_dec = jnp.pad(b_dec, ((0, 0), (0, v_pad - V_param)))

    grid = (n_pad // row_tile, v_pad // v_tile)
    out_dtype = features.dtype
    scratch_dtype = w_dec.dtype
    kernel = _make_lm_head_kernel(eps)

    vmem_est = _estimate_vmem_bytes(row_tile, H, v_tile, x.dtype, w_dec.dtype,
                                    out_dtype, scratch_dtype, const_bufs=2)
    vmem_limit = int(min(max(vmem_est * 1.5 + (4 << 20), 32 << 20),
                         cfg["vmem_cap"]))

    def call(single_buffer_consts: bool):
        const_kwargs = (dict(pipeline_mode=pl.Buffered(1))
                        if single_buffer_consts else {})
        grid_spec = pltpu.PrefetchScalarGridSpec(
            num_scalar_prefetch=0,
            grid=grid,
            in_specs=[
                pl.BlockSpec((row_tile, H), lambda i, j: (i, 0)),    # x rows
                pl.BlockSpec((H, H), lambda i, j: (0, 0),
                             **const_kwargs),                        # dense W
                pl.BlockSpec((1, H), lambda i, j: (0, 0),
                             **const_kwargs),                        # dense b
                pl.BlockSpec((1, H), lambda i, j: (0, 0),
                             **const_kwargs),                        # LN gamma
                pl.BlockSpec((1, H), lambda i, j: (0, 0),
                             **const_kwargs),                        # LN beta
                pl.BlockSpec((H, v_tile), lambda i, j: (0, j)),      # decoder W tile
                pl.BlockSpec((1, v_tile), lambda i, j: (0, j)),      # decoder b tile
            ],
            out_specs=pl.BlockSpec((row_tile, v_tile), lambda i, j: (i, j)),
            scratch_shapes=[pltpu.VMEM((row_tile, H), scratch_dtype)],
        )
        return pl.pallas_call(
            kernel,
            out_shape=jax.ShapeDtypeStruct((n_pad, v_pad), out_dtype),
            grid_spec=grid_spec,
            compiler_params=pltpu.CompilerParams(
                dimension_semantics=("parallel", "arbitrary"),
                vmem_limit_bytes=vmem_limit,
            ),
        )(x, w_dense, b_dense, gamma, beta, w_dec, b_dec)

    try:
        # Single-buffer the grid-invariant inputs (saves an H*H weight copy).
        out = call(True)
    except Exception:
        # Fallback for JAX versions where pipeline_mode isn't supported here.
        out = call(False)

    return out[:N, :V_out].reshape(B, S, V_out)


def init_params(key, hidden_size, vocab_size, dtype=jnp.float32):
    """Deterministic synthetic parameters with nn.Linear-like scales."""
    k1, k2, k3 = jax.random.split(key, 3)
    lim_d = 1.0 / math.sqrt(hidden_size)
    return {
        # stored (in, out): transpose of PyTorch nn.Linear weight
        "w_dense": jax.random.uniform(k1, (hidden_size, hidden_size),
                                      minval=-lim_d, maxval=lim_d, dtype=dtype),
        "b_dense": jax.random.uniform(k2, (1, hidden_size),
                                      minval=-lim_d, maxval=lim_d, dtype=dtype),
        "gamma": jnp.ones((1, hidden_size), dtype=dtype),
        "beta": jnp.zeros((1, hidden_size), dtype=dtype),
        "w_dec": jax.random.uniform(k3, (hidden_size, vocab_size),
                                    minval=-lim_d, maxval=lim_d, dtype=dtype),
        # self.bias = nn.Parameter(torch.zeros(vocab_size)); tied to decoder.bias
        "b_dec": jnp.zeros((1, vocab_size), dtype=dtype),
    }


def reference_lm_head(features, params, eps=1e-5):
    x = features.astype(jnp.float32)
    h = x @ params["w_dense"].astype(jnp.float32) \
        + params["b_dense"][0].astype(jnp.float32)
    h = 0.5 * h * (1.0 + lax.erf(h / jnp.sqrt(2.0)))
    mu = jnp.mean(h, axis=-1, keepdims=True)
    var = jnp.mean(jnp.square(h - mu), axis=-1, keepdims=True)
    h = (h - mu) * lax.rsqrt(var + eps)
    h = h * params["gamma"][0].astype(jnp.float32) \
        + params["beta"][0].astype(jnp.float32)
    y = h @ params["w_dec"].astype(jnp.float32) \
        + params["b_dec"][0].astype(jnp.float32)
    return y.astype(features.dtype)


if __name__ == "__main__":
    EPS = 1e-5
    key = jax.random.PRNGKey(0)
    kx, kp, kx2, kp2 = jax.random.split(key, 4)

    # --- primary small config: batch=2, seq=8, hidden=32, vocab=512 (f32) ---
    B, S, H, V = 2, 8, 32, 512
    features = jax.random.normal(kx, (B, S, H), dtype=jnp.float32)
    params = init_params(kp, H, V)

    out = jax.block_until_ready(roberta_lm_head(features, params, eps=EPS))
    ref = reference_lm_head(features, params, eps=EPS)
    assert out.shape == (B, S, V), out.shape
    assert jnp.allclose(out, ref, atol=1e-4, rtol=1e-4), \
        float(jnp.max(jnp.abs(out - ref)))

    # --- odd shapes: exercise row / vocab padding paths ---
    B2, S2, H2, V2 = 3, 5, 32, 200
    features2 = jax.random.normal(kx2, (B2, S2, H2), dtype=jnp.float32)
    params2 = init_params(kp2, H2, V2)
    out2 = jax.block_until_ready(roberta_lm_head(features2, params2, eps=EPS))
    ref2 = reference_lm_head(features2, params2, eps=EPS)
    assert out2.shape == (B2, S2, V2), out2.shape
    assert jnp.allclose(out2, ref2, atol=1e-4, rtol=1e-4), \
        float(jnp.max(jnp.abs(out2 - ref2)))

    # --- production path: bf16 MXU operands + pre-padded decoder weights ---
    prep, true_v = prepare_params(params, dtype=jnp.bfloat16)
    out3 = jax.block_until_ready(
        roberta_lm_head(features, prep, eps=EPS, vocab_size=true_v))
    assert out3.shape == (B, S, V), out3.shape
    # bf16 operands -> looser tolerance (expected precision change, not a bug).
    assert jnp.allclose(out3, ref, atol=1e-1, rtol=1e-1), \
        float(jnp.max(jnp.abs(out3 - ref)))

    print("KERNEL_OK")
</pallas_src>

<mosaic_0001>
module attributes {stable_mosaic.version = 11 : i64} {
  func.func @kernel(%arg0: i32, %arg1: i32, %arg2: memref<16x32xf32, #tpu.memory_space<vmem>>, %arg3: memref<32x32xf32, #tpu.memory_space<vmem>>, %arg4: memref<1x32xf32, #tpu.memory_space<vmem>>, %arg5: memref<1x32xf32, #tpu.memory_space<vmem>>, %arg6: memref<1x32xf32, #tpu.memory_space<vmem>>, %arg7: memref<32x512xf32, #tpu.memory_space<vmem>>, %arg8: memref<1x512xf32, #tpu.memory_space<vmem>>, %arg9: memref<16x512xf32, #tpu.memory_space<vmem>>, %arg10: memref<16x32xf32, #tpu.memory_space<vmem>>) attributes {dimension_semantics = [#tpu.dimension_semantics<parallel>, #tpu.dimension_semantics<arbitrary>], iteration_bounds = array<i64: 1, 1>, scalar_prefetch = 0 : i64, scratch_operands = 1 : i64, tpu.core_type = #tpu.core_type<tc>, window_params = [{transform_indices = @transform_0, window_bounds = array<i64: 16, 32>}, {pipeline_mode = #tpu.pipeline_mode<synchronous>, transform_indices = @transform_1, window_bounds = array<i64: 32, 32>}, {pipeline_mode = #tpu.pipeline_mode<synchronous>, transform_indices = @transform_2, window_bounds = array<i64: 1, 32>}, {pipeline_mode = #tpu.pipeline_mode<synchronous>, transform_indices = @transform_3, window_bounds = array<i64: 1, 32>}, {pipeline_mode = #tpu.pipeline_mode<synchronous>, transform_indices = @transform_4, window_bounds = array<i64: 1, 32>}, {transform_indices = @transform_5, window_bounds = array<i64: 32, 512>}, {transform_indices = @transform_6, window_bounds = array<i64: 1, 512>}, {transform_indices = @transform_7, window_bounds = array<i64: 16, 512>}]} {
    %c0_i32 = arith.constant 0 : i32
    %0 = arith.cmpi eq, %arg1, %c0_i32 : i32
    %1 = arith.extui %0 : i1 to i32
    %c0_i32_0 = arith.constant 0 : i32
    %2 = arith.cmpi ne, %1, %c0_i32_0 : i32
    scf.if %2 {
      %c0_8 = arith.constant 0 : index
      %c0_9 = arith.constant 0 : index
      %10 = vector.load %arg2[%c0_8, %c0_9] : memref<16x32xf32, #tpu.memory_space<vmem>>, vector<16x32xf32>
      %c0_10 = arith.constant 0 : index
      %c0_11 = arith.constant 0 : index
      %11 = vector.load %arg3[%c0_10, %c0_11] : memref<32x32xf32, #tpu.memory_space<vmem>>, vector<32x32xf32>
      %cst_12 = arith.constant dense<0.000000e+00> : vector<16x32xf32>
      %12 = tpu.matmul %10, %11, %cst_12 {dimension_numbers = #tpu.dot_dimension_numbers<[1], [0], [0], [1], [0, 0, 1, 1], [], []>} : vector<16x32xf32>, vector<32x32xf32>, vector<16x32xf32> -> vector<16x32xf32>
      %c0_13 = arith.constant 0 : index
      %c0_14 = arith.constant 0 : index
      %13 = vector.load %arg4[%c0_13, %c0_14] : memref<1x32xf32, #tpu.memory_space<vmem>>, vector<1x32xf32>
      %14 = vector.broadcast %13 : vector<1x32xf32> to vector<16x32xf32>
      %15 = arith.addf %12, %14 : vector<16x32xf32>
      %cst_15 = arith.constant 5.000000e-01 : f32
      %16 = vector.broadcast %cst_15 : f32 to vector<16x32xf32>
      %17 = arith.mulf %16, %15 : vector<16x32xf32>
      %cst_16 = arith.constant 0.707106769 : f32
      %18 = vector.broadcast %cst_16 : f32 to vector<16x32xf32>
      %19 = arith.mulf %15, %18 : vector<16x32xf32>
      %20 = math.erf %19 : vector<16x32xf32>
      %cst_17 = arith.constant 1.000000e+00 : f32
      %21 = vector.broadcast %cst_17 : f32 to vector<16x32xf32>
      %22 = arith.addf %21, %20 : vector<16x32xf32>
      %23 = arith.mulf %17, %22 : vector<16x32xf32>
      %cst_18 = arith.constant dense<0.000000e+00> : vector<16xf32>
      %24 = vector.multi_reduction <add>, %23, %cst_18 [1] : vector<16x32xf32> to vector<16xf32>
      %25 = vector.shape_cast %24 : vector<16xf32> to vector<16x1xf32>
      %cst_19 = arith.constant 3.200000e+01 : f32
      %26 = vector.broadcast %cst_19 : f32 to vector<16x1xf32>
      %27 = arith.divf %25, %26 : vector<16x1xf32>
      %28 = vector.broadcast %27 : vector<16x1xf32> to vector<16x32xf32>
      %29 = arith.subf %23, %28 : vector<16x32xf32>
      %30 = arith.mulf %29, %29 : vector<16x32xf32>
      %cst_20 = arith.constant dense<0.000000e+00> : vector<16xf32>
      %31 = vector.multi_reduction <add>, %30, %cst_20 [1] : vector<16x32xf32> to vector<16xf32>
      %32 = vector.shape_cast %31 : vector<16xf32> to vector<16x1xf32>
      %cst_21 = arith.constant 3.200000e+01 : f32
      %33 = vector.broadcast %cst_21 : f32 to vector<16x1xf32>
      %34 = arith.divf %32, %33 : vector<16x1xf32>
      %35 = vector.broadcast %27 : vector<16x1xf32> to vector<16x32xf32>
      %36 = arith.subf %23, %35 : vector<16x32xf32>
      %cst_22 = arith.constant 9.99999974E-6 : f32
      %37 = vector.broadcast %cst_22 : f32 to vector<16x1xf32>
      %38 = arith.addf %34, %37 : vector<16x1xf32>
      %39 = math.rsqrt %38 : vector<16x1xf32>
      %40 = vector.broadcast %39 : vector<16x1xf32> to vector<16x32xf32>
      %41 = arith.mulf %36, %40 : vector<16x32xf32>
      %c0_23 = arith.constant 0 : index
      %c0_24 = arith.constant 0 : index
      %42 = vector.load %arg5[%c0_23, %c0_24] : memref<1x32xf32, #tpu.memory_space<vmem>>, vector<1x32xf32>
      %43 = vector.broadcast %42 : vector<1x32xf32> to vector<16x32xf32>
      %44 = arith.mulf %41, %43 : vector<16x32xf32>
      %c0_25 = arith.constant 0 : index
      %c0_26 = arith.constant 0 : index
      %45 = vector.load %arg6[%c0_25, %c0_26] : memref<1x32xf32, #tpu.memory_space<vmem>>, vector<1x32xf32>
      %46 = vector.broadcast %45 : vector<1x32xf32> to vector<16x32xf32>
      %47 = arith.addf %44, %46 : vector<16x32xf32>
      %c0_27 = arith.constant 0 : index
      %c0_28 = arith.constant 0 : index
      %48 = vector.load %arg10[%c0_27, %c0_28] : memref<16x32xf32, #tpu.memory_space<vmem>>, vector<16x32xf32>
      tpu.vector_store %arg10[%c0_27, %c0_28], %47 {strides = array<i32>} : memref<16x32xf32, #tpu.memory_space<vmem>>, vector<16x32xf32>,
    } else {
    }
    %c0 = arith.constant 0 : index
    %c0_1 = arith.constant 0 : index
    %3 = vector.load %arg10[%c0, %c0_1] : memref<16x32xf32, #tpu.memory_space<vmem>>, vector<16x32xf32>
    %c0_2 = arith.constant 0 : index
    %c0_3 = arith.constant 0 : index
    %4 = vector.load %arg7[%c0_2, %c0_3] : memref<32x512xf32, #tpu.memory_space<vmem>>, vector<32x512xf32>
    %cst = arith.constant dense<0.000000e+00> : vector<16x512xf32>
    %5 = tpu.matmul %3, %4, %cst {dimension_numbers = #tpu.dot_dimension_numbers<[1], [0], [0], [1], [0, 0, 1, 1], [], []>} : vector<16x32xf32>, vector<32x512xf32>, vector<16x512xf32> -> vector<16x512xf32>
    %c0_4 = arith.constant 0 : index
    %c0_5 = arith.constant 0 : index
    %6 = vector.load %arg8[%c0_4, %c0_5] : memref<1x512xf32, #tpu.memory_space<vmem>>, vector<1x512xf32>
    %7 = vector.broadcast %6 : vector<1x512xf32> to vector<16x512xf32>
    %8 = arith.addf %5, %7 : vector<16x512xf32>
    %c0_6 = arith.constant 0 : index
    %c0_7 = arith.constant 0 : index
    %9 = vector.load %arg9[%c0_6, %c0_7] : memref<16x512xf32, #tpu.memory_space<vmem>>, vector<16x512xf32>
    tpu.vector_store %arg9[%c0_6, %c0_7], %8 {strides = array<i32>} : memref<16x512xf32, #tpu.memory_space<vmem>>, vector<16x512xf32>,
    return
  }
  func.func @transform_0(%arg0: i32, %arg1: i32) -> (i32, i32) {
    %c0_i32 = arith.constant 0 : i32
    %c0_i32_0 = arith.constant 0 : i32
    return %arg0, %c0_i32 : i32, i32
  }
  func.func @transform_1(%arg0: i32, %arg1: i32) -> (i32, i32) {
    %c0_i32 = arith.constant 0 : i32
    %c0_i32_0 = arith.constant 0 : i32
    %c0_i32_1 = arith.constant 0 : i32
    return %c0_i32, %c0_i32_0 : i32, i32
  }
  func.func @transform_2(%arg0: i32, %arg1: i32) -> (i32, i32) {
    %c0_i32 = arith.constant 0 : i32
    %c0_i32_0 = arith.constant 0 : i32
    %c0_i32_1 = arith.constant 0 : i32
    return %c0_i32, %c0_i32_0 : i32, i32
  }
  func.func @transform_3(%arg0: i32, %arg1: i32) -> (i32, i32) {
    %c0_i32 = arith.constant 0 : i32
    %c0_i32_0 = arith.constant 0 : i32
    %c0_i32_1 = arith.constant 0 : i32
    return %c0_i32, %c0_i32_0 : i32, i32
  }
  func.func @transform_4(%arg0: i32, %arg1: i32) -> (i32, i32) {
    %c0_i32 = arith.constant 0 : i32
    %c0_i32_0 = arith.constant 0 : i32
    %c0_i32_1 = arith.constant 0 : i32
    return %c0_i32, %c0_i32_0 : i32, i32
  }
  func.func @transform_5(%arg0: i32, %arg1: i32) -> (i32, i32) {
    %c0_i32 = arith.constant 0 : i32
    %c0_i32_0 = arith.constant 0 : i32
    return %c0_i32, %arg1 : i32, i32
  }
  func.func @transform_6(%arg0: i32, %arg1: i32) -> (i32, i32) {
    %c0_i32 = arith.constant 0 : i32
    %c0_i32_0 = arith.constant 0 : i32
    return %c0_i32, %arg1 : i32, i32
  }
  func.func @transform_7(%arg0: i32, %arg1: i32) -> (i32, i32) {
    %c0_i32 = arith.constant 0 : i32
    return %arg0, %arg1 : i32, i32
  }
}

module attributes {stable_mosaic.version = 11 : i64} {
  func.func @kernel(%arg0: i32, %arg1: i32, %arg2: memref<16x32xf32, #tpu.memory_space<vmem>>, %arg3: memref<32x32xf32, #tpu.memory_space<vmem>>, %arg4: memref<1x32xf32, #tpu.memory_space<vmem>>, %arg5: memref<1x32xf32, #tpu.memory_space<vmem>>, %arg6: memref<1x32xf32, #tpu.memory_space<vmem>>, %arg7: memref<32x512xf32, #tpu.memory_space<vmem>>, %arg8: memref<1x512xf32, #tpu.memory_space<vmem>>, %arg9: memref<16x512xf32, #tpu.memory_space<vmem>>, %arg10: memref<16x32xf32, #tpu.memory_space<vmem>>) attributes {dimension_semantics = [#tpu.dimension_semantics<parallel>, #tpu.dimension_semantics<arbitrary>], iteration_bounds = array<i64: 1, 1>, scalar_prefetch = 0 : i64, scratch_operands = 1 : i64, tpu.core_type = #tpu.core_type<tc>, window_params = [{transform_indices = @transform_0, window_bounds = array<i64: 16, 32>}, {pipeline_mode = #tpu.pipeline_mode<synchronous>, transform_indices = @transform_1, window_bounds = array<i64: 32, 32>}, {pipeline_mode = #tpu.pipeline_mode<synchronous>, transform_indices = @transform_2, window_bounds = array<i64: 1, 32>}, {pipeline_mode = #tpu.pipeline_mode<synchronous>, transform_indices = @transform_3, window_bounds = array<i64: 1, 32>}, {pipeline_mode = #tpu.pipeline_mode<synchronous>, transform_indices = @transform_4, window_bounds = array<i64: 1, 32>}, {transform_indices = @transform_5, window_bounds = array<i64: 32, 512>}, {transform_indices = @transform_6, window_bounds = array<i64: 1, 512>}, {transform_indices = @transform_7, window_bounds = array<i64: 16, 512>}]} {
    %c0_i32 = arith.constant 0 : i32
    %0 = arith.cmpi eq, %arg1, %c0_i32 : i32
    %1 = arith.extui %0 : i1 to i32
    %c0_i32_0 = arith.constant 0 : i32
    %2 = arith.cmpi ne, %1, %c0_i32_0 : i32
    scf.if %2 {
      %c0_8 = arith.constant 0 : index
      %c0_9 = arith.constant 0 : index
      %10 = vector.load %arg2[%c0_8, %c0_9] : memref<16x32xf32, #tpu.memory_space<vmem>>, vector<16x32xf32>
      %c0_10 = arith.constant 0 : index
      %c0_11 = arith.constant 0 : index
      %11 = vector.load %arg3[%c0_10, %c0_11] : memref<32x32xf32, #tpu.memory_space<vmem>>, vector<32x32xf32>
      %cst_12 = arith.constant dense<0.000000e+00> : vector<16x32xf32>
      %12 = tpu.matmul %10, %11, %cst_12 {dimension_numbers = #tpu.dot_dimension_numbers<[1], [0], [0], [1], [0, 0, 1, 1], [], []>} : vector<16x32xf32>, vector<32x32xf32>, vector<16x32xf32> -> vector<16x32xf32>
      %c0_13 = arith.constant 0 : index
      %c0_14 = arith.constant 0 : index
      %13 = vector.load %arg4[%c0_13, %c0_14] : memref<1x32xf32, #tpu.memory_space<vmem>>, vector<1x32xf32>
      %14 = vector.broadcast %13 : vector<1x32xf32> to vector<16x32xf32>
      %15 = arith.addf %12, %14 : vector<16x32xf32>
      %cst_15 = arith.constant 5.000000e-01 : f32
      %16 = vector.broadcast %cst_15 : f32 to vector<16x32xf32>
      %17 = arith.mulf %16, %15 : vector<16x32xf32>
      %cst_16 = arith.constant 0.707106769 : f32
      %18 = vector.broadcast %cst_16 : f32 to vector<16x32xf32>
      %19 = arith.mulf %15, %18 : vector<16x32xf32>
      %20 = math.erf %19 : vector<16x32xf32>
      %cst_17 = arith.constant 1.000000e+00 : f32
      %21 = vector.broadcast %cst_17 : f32 to vector<16x32xf32>
      %22 = arith.addf %21, %20 : vector<16x32xf32>
      %23 = arith.mulf %17, %22 : vector<16x32xf32>
      %cst_18 = arith.constant dense<0.000000e+00> : vector<16xf32>
      %24 = vector.multi_reduction <add>, %23, %cst_18 [1] : vector<16x32xf32> to vector<16xf32>
      %25 = vector.shape_cast %24 : vector<16xf32> to vector<16x1xf32>
      %cst_19 = arith.constant 3.200000e+01 : f32
      %26 = vector.broadcast %cst_19 : f32 to vector<16x1xf32>
      %27 = arith.divf %25, %26 : vector<16x1xf32>
      %28 = vector.broadcast %27 : vector<16x1xf32> to vector<16x32xf32>
      %29 = arith.subf %23, %28 : vector<16x32xf32>
      %30 = arith.mulf %29, %29 : vector<16x32xf32>
      %cst_20 = arith.constant dense<0.000000e+00> : vector<16xf32>
      %31 = vector.multi_reduction <add>, %30, %cst_20 [1] : vector<16x32xf32> to vector<16xf32>
      %32 = vector.shape_cast %31 : vector<16xf32> to vector<16x1xf32>
      %cst_21 = arith.constant 3.200000e+01 : f32
      %33 = vector.broadcast %cst_21 : f32 to vector<16x1xf32>
      %34 = arith.divf %32, %33 : vector<16x1xf32>
      %35 = vector.broadcast %27 : vector<16x1xf32> to vector<16x32xf32>
      %36 = arith.subf %23, %35 : vector<16x32xf32>
      %cst_22 = arith.constant 9.99999974E-6 : f32
      %37 = vector.broadcast %cst_22 : f32 to vector<16x1xf32>
      %38 = arith.addf %34, %37 : vector<16x1xf32>
      %39 = math.rsqrt %38 : vector<16x1xf32>
      %40 = vector.broadcast %39 : vector<16x1xf32> to vector<16x32xf32>
      %41 = arith.mulf %36, %40 : vector<16x32xf32>
      %c0_23 = arith.constant 0 : index
      %c0_24 = arith.constant 0 : index
      %42 = vector.load %arg5[%c0_23, %c0_24] : memref<1x32xf32, #tpu.memory_space<vmem>>, vector<1x32xf32>
      %43 = vector.broadcast %42 : vector<1x32xf32> to vector<16x32xf32>
      %44 = arith.mulf %41, %43 : vector<16x32xf32>
      %c0_25 = arith.constant 0 : index
      %c0_26 = arith.constant 0 : index
      %45 = vector.load %arg6[%c0_25, %c0_26] : memref<1x32xf32, #tpu.memory_space<vmem>>, vector<1x32xf32>
      %46 = vector.broadcast %45 : vector<1x32xf32> to vector<16x32xf32>
      %47 = arith.addf %44, %46 : vector<16x32xf32>
      %c0_27 = arith.constant 0 : index
      %c0_28 = arith.constant 0 : index
      %48 = vector.load %arg10[%c0_27, %c0_28] : memref<16x32xf32, #tpu.memory_space<vmem>>, vector<16x32xf32>
      tpu.vector_store %arg10[%c0_27, %c0_28], %47 {strides = array<i32>} : memref<16x32xf32, #tpu.memory_space<vmem>>, vector<16x32xf32>,
    } else {
    }
    %c0 = arith.constant 0 : index
    %c0_1 = arith.constant 0 : index
    %3 = vector.load %arg10[%c0, %c0_1] : memref<16x32xf32, #tpu.memory_space<vmem>>, vector<16x32xf32>
    %c0_2 = arith.constant 0 : index
    %c0_3 = arith.constant 0 : index
    %4 = vector.load %arg7[%c0_2, %c0_3] : memref<32x512xf32, #tpu.memory_space<vmem>>, vector<32x512xf32>
    %cst = arith.constant dense<0.000000e+00> : vector<16x512xf32>
    %5 = tpu.matmul %3, %4, %cst {dimension_numbers = #tpu.dot_dimension_numbers<[1], [0], [0], [1], [0, 0, 1, 1], [], []>} : vector<16x32xf32>, vector<32x512xf32>, vector<16x512xf32> -> vector<16x512xf32>
    %c0_4 = arith.constant 0 : index
    %c0_5 = arith.constant 0 : index
    %6 = vector.load %arg8[%c0_4, %c0_5] : memref<1x512xf32, #tpu.memory_space<vmem>>, vector<1x512xf32>
    %7 = vector.broadcast %6 : vector<1x512xf32> to vector<16x512xf32>
    %8 = arith.addf %5, %7 : vector<16x512xf32>
    %c0_6 = arith.constant 0 : index
    %c0_7 = arith.constant 0 : index
    %9 = vector.load %arg9[%c0_6, %c0_7] : memref<16x512xf32, #tpu.memory_space<vmem>>, vector<16x512xf32>
    tpu.vector_store %arg9[%c0_6, %c0_7], %8 {strides = array<i32>} : memref<16x512xf32, #tpu.memory_space<vmem>>, vector<16x512xf32>,
    return
  }
  func.func @transform_0(%arg0: i32, %arg1: i32) -> (i32, i32) {
    %c0_i32 = arith.constant 0 : i32
    %c0_i32_0 = arith.constant 0 : i32
    return %arg0, %c0_i32 : i32, i32
  }
  func.func @transform_1(%arg0: i32, %arg1: i32) -> (i32, i32) {
    %c0_i32 = arith.constant 0 : i32
    %c0_i32_0 = arith.constant 0 : i32
    %c0_i32_1 = arith.constant 0 : i32
    return %c0_i32, %c0_i32_0 : i32, i32
  }
  func.func @transform_2(%arg0: i32, %arg1: i32) -> (i32, i32) {
    %c0_i32 = arith.constant 0 : i32
    %c0_i32_0 = arith.constant 0 : i32
    %c0_i32_1 = arith.constant 0 : i32
    return %c0_i32, %c0_i32_0 : i32, i32
  }
  func.func @transform_3(%arg0: i32, %arg1: i32) -> (i32, i32) {
    %c0_i32 = arith.constant 0 : i32
    %c0_i32_0 = arith.constant 0 : i32
    %c0_i32_1 = arith.constant 0 : i32
    return %c0_i32, %c0_i32_0 : i32, i32
  }
  func.func @transform_4(%arg0: i32, %arg1: i32) -> (i32, i32) {
    %c0_i32 = arith.constant 0 : i32
    %c0_i32_0 = arith.constant 0 : i32
    %c0_i32_1 = arith.constant 0 : i32
    return %c0_i32, %c0_i32_0 : i32, i32
  }
  func.func @transform_5(%arg0: i32, %arg1: i32) -> (i32, i32) {
    %c0_i32 = arith.constant 0 : i32
    %c0_i32_0 = arith.constant 0 : i32
    return %c0_i32, %arg1 : i32, i32
  }
  func.func @transform_6(%arg0: i32, %arg1: i32) -> (i32, i32) {
    %c0_i32 = arith.constant 0 : i32
    %c0_i32_0 = arith.constant 0 : i32
    return %c0_i32, %arg1 : i32, i32
  }
  func.func @transform_7(%arg0: i32, %arg1: i32) -> (i32, i32) {
    %c0_i32 = arith.constant 0 : i32
    return %arg0, %arg1 : i32, i32
  }
}

</mosaic_0001>

<bundles_post_ra>
// kernel: tpu_custom_call.1
= control target key start
LH: loop header
LB: loop body
LE: loop exit
PB: predicated region body
PF: predicated region fallthrough
CT: control target
= control target key end

     0   :  { %12 = vsyncpa [#allocation4], 0  ;;  %s771_s0 = inlined_call_operand.hbm [shape: f32[16,32], index: 0, kind: input, shape index: {}]   ;;  %s772_s1 = inlined_call_operand.hbm [shape: f32[32,32], index: 1, kind: input, shape index: {}]   ;;  %s773_s2 = inlined_call_operand.vmem [shape: f32[1,32], index: 2, kind: input, shape index: {}]   ;;  %s774_s3 = inlined_call_operand.hbm [shape: f32[1,32], index: 3, kind: input, shape index: {}]   ;;  %s775_s4 = inlined_call_operand.hbm [shape: f32[1,32], index: 4, kind: input, shape index: {}]   ;;  %s776_s5 = inlined_call_operand.hbm [shape: f32[32,512], index: 5, kind: input, shape index: {}]   ;;  %s777_s6 = inlined_call_operand.vmem [shape: f32[1,512], index: 6, kind: input, shape index: {}]   ;;  %s778_s7 = inlined_call_operand.hbm [shape: f32[16,512], index: 7, kind: output, shape index: {}]  }
   0x1   :  { %13 = vsyncpa [#allocation7], 0 }
   0x2   :  { %14 = vsyncpa [#allocation10], 0 }
   0x3   :  { %15 = vsyncpa [#allocation5], 0  ;;  %s33_s26 = sshll.u32 %s772_s1, 4  ;;  %s646_s27 = smov [#allocation6]   ;;  %s34_s26 = int_to_ptr.hbm [resolvable:$true] %s33_s26 }
   0x4   :  { %s35_s28 = sshll.u32 %s646_s27, 4  ;;  %s60_s8 = sshll.u32 %s775_s4, 4  ;;  %s36_s28 = int_to_ptr.vmem [resolvable:$true] %s35_s28  ;;  %s61_s8 = int_to_ptr.hbm [resolvable:$true] %s60_s8 }
   0x5   :  { %s647_s9 = smov 128   ;;  %s648_s10 = smov 8  }
   0x6   :  { %41 = dma.hbm_to_vmem [thread:$0]  %s34_s26, 512, %s36_s28, [#allocation7], %s647_s9, %s647_s9, %s648_s10  }
   0x7   :  { %s649_s11 = smov [#allocation9]   ;;  %s20_s15 = sshll.u32 %s771_s0, 4  ;;  %s21_s15 = int_to_ptr.hbm [resolvable:$true] %s20_s15 }
   0x8   :  { %s62_s12 = sshll.u32 %s649_s11, 4  ;;  %s49_s17 = sshll.u32 %s774_s3, 4  ;;  %s63_s12 = int_to_ptr.vmem [resolvable:$true] %s62_s12  ;;  %s50_s17 = int_to_ptr.hbm [resolvable:$true] %s49_s17 }
   0x9   :  { %65 = dma.hbm_to_vmem [thread:$0]  %s61_s8, 16, %s63_s12, [#allocation10]  }
   0xa   :  { %s650_s18 = smov [#allocation3]   ;;  %s651_s4 = smov [#allocation8]  }
   0xb   :  { %s22_s19 = sshll.u32 %s650_s18, 4  ;;  %s51_s20 = sshll.u32 %s651_s4, 4  ;;  %s23_s19 = int_to_ptr.vmem [resolvable:$true] %s22_s19  ;;  %s52_s20 = int_to_ptr.vmem [resolvable:$true] %s51_s20 }
   0xc   :  { %28 = dma.hbm_to_vmem [thread:$0]  %s21_s15, 256, %s23_s19, [#allocation4], %s647_s9, %s647_s9, %s648_s10  }
   0xd   :  { %s70_s23 = sshll.u32 %s776_s5, 4  ;;  %s652_s0 = smov [#allocation11]   ;;  %s71_s23 = int_to_ptr.hbm [resolvable:$true] %s70_s23 }
   0xe   :  { %54 = dma.hbm_to_vmem [thread:$0]  %s50_s17, 16, %s52_s20, [#allocation7]  }
   0xf   :  { %s72_s24 = sshll.u32 %s652_s0, 4  ;;  %s653_s25 = smov 512   ;;  %s73_s24 = int_to_ptr.vmem [resolvable:$true] %s72_s24 }
  0x10   :  { %s654_s26 = smov 32  }
  0x11   :  { %78 = dma.hbm_to_vmem [thread:$0]  %s71_s23, 2048, %s73_s24, [#allocation10], %s653_s25, %s653_s25, %s654_s26  }
  0x12   :  { %638 = dma.done.wait [#allocation4], 256  }
  0x13   :  { %639 = vsyncadd [#allocation4], 4294967040 }
  0x14   :  { %640 = dma.done.wait [#allocation7], 528  }
  0x15   :  { %641 = vsyncadd [#allocation7], 4294966768 }
  0x16   :  { %642 = dma.done.wait [#allocation10], 2064  }
  0x17   :  { %643 = vsyncadd [#allocation10], 4294965232  ;;  %v110_v0 = vld [vmem:[#allocation6 + $0x18] sm:$0xff]  ;;  %v109_v1 = vld [vmem:[#allocation6 + $0x10] sm:$0xff]  ;;  %vm115_vm0 = vcmask 261120   ;;  %s439_s8 = sshll.u32 %s778_s7, 4  ;;  %s440_s8 = int_to_ptr.hbm [resolvable:$true] %s439_s8 }
  0x18   :  { %134 = vmatpush.msra.mxu0 %v110_v0  ;;  %466 = vmatpush.msra.mxu1 %v110_v0  ;;  %v108_v2 = vld [vmem:[#allocation6 + $0x8] sm:$0xff]  ;;  %v107_v3 = vld [vmem:[#allocation6] sm:$0xff]  ;;  %v105_v4 = vld [vmem:[#allocation3] sm:$0xff] }
  0x19   :  { %v106_v5 = vld [vmem:[#allocation3 + $0x8] sm:$0xff]  ;;  %v481_v6 = vld [vmem:[%s773_s2] ss:$0 sm:$0xff] }
  0x1a   :  { %135 = vmatpush.msra.mxu0 %v109_v1  ;;  %467 = vmatpush.msra.mxu1 %v109_v1 }
  0x1c   :  { %136 = vmatpush.msra.mxu0 %v108_v2  ;;  %468 = vmatpush.msra.mxu1 %v108_v2 }
  0x1e   :  { %137 = vmatpush.msra.mxu0 %v107_v3  ;;  %469 = vmatpush.msra.mxu1 %v107_v3 }
  0x1f   :  { %454 = vmatmul.msk.f32.vlgmr.msra.gmra.mxu0 %vm115_vm0, %v105_v4  ;;  %455 = vmatmul.msk.f32.vlgmr.msra.gmra.mxu1 %vm115_vm0, %v106_v5 }
  0x9c   :  { %v139_v7 = vpop.f32.mrf.mxu0  ;;  %v142_v8 = vpop.f32.mrf.mxu1 }
  0x9d   :  { %v720_v9 = vadd.f32 %v481_v6, %v139_v7  ;;  %v722_v10 = vadd.f32 %v481_v6, %v142_v8 }
  0x9f   :  { %v725_v11 = vmul.f32 0.70710677, %v720_v9  ;;  %v728_v12 = vmul.f32 0.70710677, %v722_v10 }
  0xa1   :  { %v149_v13 = vmul.f32 %v725_v11, %v725_v11  ;;  %v189_v14 = vmul.f32 %v728_v12, %v728_v12 }
  0xa3   :  { %v150_v15 = vmin.f32 %v149_v13, 16.0  ;;  %v190_v16 = vmin.f32 %v189_v14, 16.0 }
  0xa5   :  { %v151_v17 = vmul.f32 2.1237322e-06, %v150_v15  ;;  %v191_v18 = vmul.f32 2.1237322e-06, %v190_v16  ;;  %v162_v19 = vmul.f32 3.8918573e-05, %v150_v15 }
  0xa6   :  { %v202_v20 = vmul.f32 3.8918573e-05, %v190_v16 }
  0xa7   :  { %v152_v21 = vadd.f32 0.00028619796, %v151_v17  ;;  %v192_v22 = vadd.f32 0.00028619796, %v191_v18  ;;  %v163_v23 = vadd.f32 0.001143296, %v162_v19 }
  0xa8   :  { %v203_v24 = vadd.f32 0.001143296, %v202_v20 }
  0xa9   :  { %v153_v25 = vmul.f32 %v152_v21, %v150_v15  ;;  %v193_v26 = vmul.f32 %v192_v22, %v190_v16  ;;  %v164_v27 = vmul.f32 %v163_v23, %v150_v15  ;;  %v145_v22 = vmul.f32 0.5, %v720_v9 }
  0xaa   :  { %v204_v28 = vmul.f32 %v203_v24, %v190_v16 }
  0xab   :  { %v154_v29 = vadd.f32 0.0036580483, %v153_v25  ;;  %v165_v30 = vadd.f32 0.014752088, %v164_v27  ;;  %v194_v32 = vadd.f32 0.0036580483, %v193_v26 }
  0xac   :  { %v205_v31 = vadd.f32 0.014752088, %v204_v28  ;;  %v146_v27 = vmul.f32 0.5, %v722_v10 }
  0xad   :  { %v166_v33 = vmul.f32 %v165_v30, %v150_v15  ;;  %v155_v35 = vmul.f32 %v154_v29, %v150_v15  ;;  %v195_v38 = vmul.f32 %v194_v32, %v190_v16  ;;  %v655_v29 = vmov 32.0  }
  0xae   :  { %v206_v34 = vmul.f32 %v205_v31, %v190_v16 }
  0xaf   :  { %v167_v36 = vadd.f32 0.112945676, %v166_v33  ;;  %v156_v41 = vadd.f32 0.05243302, %v155_v35  ;;  %v196_v44 = vadd.f32 0.05243302, %v195_v38 }
  0xb0   :  { %v207_v37 = vadd.f32 0.112945676, %v206_v34 }
  0xb1   :  { %v168_v39 = vmul.f32 %v167_v36, %v150_v15  ;;  %v157_v47 = vmul.f32 %v156_v41, %v150_v15  ;;  %v197_v50 = vmul.f32 %v196_v44, %v190_v16  ;;  %v312_v44 = vld [vmem:[#allocation11 + $0x60] sm:$0xff] }
  0xb2   :  { %v208_v40 = vmul.f32 %v207_v37, %v190_v16  ;;  %345 = vmatpush.msrb.mxu1 %v312_v44 }
  0xb3   :  { %v169_v42 = vadd.f32 0.4994258, %v168_v39  ;;  %v158_v51 = vadd.f32 0.18741608, %v157_v47  ;;  %v198_v52 = vadd.f32 0.18741608, %v197_v50 }
  0xb4   :  { %v209_v43 = vadd.f32 0.4994258, %v208_v40  ;;  %v308_v50 = vld [vmem:[#allocation11 + $0x40] sm:$0xff] }
  0xb5   :  { %v170_v45 = vmul.f32 %v169_v42, %v150_v15  ;;  %v159_v54 = vmul.f32 %v158_v51, %v150_v15  ;;  %v199_v57 = vmul.f32 %v198_v52, %v190_v16  ;;  %v309_v51 = vld [vmem:[#allocation11 + $0x48] sm:$0xff]  ;;  %v310_v52 = vld [vmem:[#allocation11 + $0x50] sm:$0xff]  ;;  %346 = vmatpush.msrb.mxu1 %v308_v50 }
  0xb6   :  { %v210_v46 = vmul.f32 %v209_v43, %v190_v16 }
  0xb7   :  { %v171_v48 = vadd.f32 1.0, %v170_v45  ;;  %v160_v60 = vadd.f32 1.1283791, %v159_v54  ;;  %v200_v2 = vadd.f32 1.1283791, %v199_v57  ;;  %v313_v45 = vld [vmem:[#allocation11 + $0x68] sm:$0xff] }
  0xb8   :  { %v211_v49 = vadd.f32 1.0, %v210_v46  ;;  %v314_v46 = vld [vmem:[#allocation11 + $0x70] sm:$0xff]  ;;  %368 = vmatpush.msra.mxu2 %v313_v45 }
  0xb9   :  { %484 = vrcp.f32 %v171_v48  ;;  %v183_v61 = vand.u32 2147483648, %v171_v48  ;;  %v181_v0 = vand.u32 2147483647, %v171_v48  ;;  %vm177_vm3 = vweird.f32 %v171_v48  ;;  %391 = vmatpush.msra.mxu3 %v314_v46  ;;  %v306_v57 = vld [vmem:[#allocation11 + $0x30] sm:$0xff] }
  0xba   :  { %486 = vrcp.f32 %v211_v49  ;;  %v223_v1 = vand.u32 2147483648, %v211_v49  ;;  %v221_v4 = vand.u32 2147483647, %v211_v49  ;;  %vm217_vm5 = vweird.f32 %v211_v49  ;;  %369 = vmatpush.msra.mxu2 %v309_v51 }
  0xbb   :  { %v184_v6 = vor.u32 1.1754944e-38, %v183_v61  ;;  %v161_v8 = vmul.f32 %v160_v60, %v725_v11  ;;  %vm182_vm6 = vcmp.eq.f32.partialorder %v181_v0, 8.507059e+37  ;;  %v201_v15 = vmul.f32 %v200_v2, %v728_v12  ;;  %392 = vmatpush.msra.mxu3 %v310_v52  ;;  %v301_v60 = vld [vmem:[#allocation11 + $0x8] sm:$0xff]  ;;  %v302_v61 = vld [vmem:[#allocation11 + $0x10] sm:$0xff] }
  0xbc   :  { %v224_v14 = vor.u32 1.1754944e-38, %v223_v1  ;;  %vm222_vm8 = vcmp.eq.f32.partialorder %v221_v4, 8.507059e+37  ;;  %488 = vrcp.f32 %v655_v29 }
  0xbd   :  { %393 = vmatpush.msra.mxu3 %v306_v57 }
  0xbf   :  { %v485_v53 = vpop.eup %484  ;;  %394 = vmatpush.msra.mxu3 %v302_v61 }
  0xc0   :  { %v487_v55 = vpop.eup %486  ;;  %v173_v56 = vmul.f32 %v485_v53, %v171_v48  ;;  %vm178_vm1 = vweird.f32 %v485_v53  ;;  %v315_v48 = vld [vmem:[#allocation11 + $0x78] sm:$0xff] }
  0xc1   :  { %v213_v58 = vmul.f32 %v487_v55, %v211_v49  ;;  %vm218_vm2 = vweird.f32 %v487_v55  ;;  %vm179_vm4 = vmor %vm177_vm3, %vm178_vm1  ;;  %414 = vmatpush.msrb.mxu0 %v315_v48 }
  0xc2   :  { %v174_v59 = vsub.f32 1.0, %v173_v56  ;;  %vm219_vm7 = vmor %vm217_vm5, %vm218_vm2  ;;  %v489_v30 = vpop.eup %488  ;;  %v305_v56 = vld [vmem:[#allocation11 + $0x28] sm:$0xff] }
  0xc3   :  { %v214_v62 = vsub.f32 1.0, %v213_v58  ;;  %v240_v31 = vmul.f32 32.0, %v489_v30  ;;  %vm244_vm9 = vweird.f32 %v489_v30  ;;  %370 = vmatpush.msra.mxu2 %v305_v56  ;;  %v307_v58 = vld [vmem:[#allocation11 + $0x38] sm:$0xff] }
  0xc4   :  { %v175_v63 = vmul.f32 %v485_v53, %v174_v59  ;;  %v300_v59 = vld [vmem:[#allocation11] sm:$0xff] }
  0xc5   :  { %v215_v3 = vmul.f32 %v487_v55, %v214_v62  ;;  %v241_v32 = vsub.f32 1.0, %v240_v31  ;;  %371 = vmatpush.msra.mxu2 %v301_v60  ;;  %v303_v62 = vld [vmem:[#allocation11 + $0x18] sm:$0xff] }
  0xc6   :  { %v176_v5 = vadd.f32 %v485_v53, %v175_v63 }
  0xc7   :  { %v216_v7 = vadd.f32 %v487_v55, %v215_v3  ;;  %v242_v33 = vmul.f32 %v489_v30, %v241_v32 }
  0xc8   :  { %v180_v13 = vsel %vm179_vm4, %v485_v53, %v176_v5  ;;  %v311_v53 = vld [vmem:[#allocation11 + $0x58] sm:$0xff] }
  0xc9   :  { %v185_v16 = vsel %vm182_vm6, %v184_v6, %v180_v13  ;;  %v220_v17 = vsel %vm219_vm7, %v487_v55, %v216_v7  ;;  %v243_v9 = vadd.f32 %v489_v30, %v242_v33  ;;  %415 = vmatpush.msrb.mxu0 %v311_v53  ;;  %v304_v55 = vld [vmem:[#allocation11 + $0x20] sm:$0xff] }
  0xca   :  { %v186_v18 = vmul.f32 %v185_v16, %v161_v8  ;;  %v225_v19 = vsel %vm222_vm8, %v224_v14, %v220_v17  ;;  %347 = vmatpush.msrb.mxu1 %v304_v55  ;;  %v482_v14 = vld [vmem:[#allocation8] ss:$0 sm:$0xff]  ;;  %v483_v17 = vld [vmem:[#allocation9] ss:$0 sm:$0xff] }
  0xcb   :  { %v226_v20 = vmul.f32 %v225_v19, %v201_v15  ;;  %v245_v34 = vsel %vm244_vm9, %v489_v30, %v243_v9  ;;  %416 = vmatpush.msrb.mxu0 %v307_v58 }
  0xcc   :  { %v456_v21 = vclamps-f32 %v186_v18, 1.0  ;;  %348 = vmatpush.msrb.mxu1 %v300_v59 }
  0xcd   :  { %v457_v24 = vclamps-f32 %v226_v20, 1.0  ;;  %417 = vmatpush.msrb.mxu0 %v303_v62 }
  0xce   :  { %v229_v23 = vadd.f32 1.0, %v456_v21 }
  0xcf   :  { %v230_v26 = vadd.f32 1.0, %v457_v24 }
  0xd0   :  { %v231_v25 = vmul.f32 %v229_v23, %v145_v22 }
  0xd1   :  { %v232_v28 = vmul.f32 %v230_v26, %v146_v27 }
  0xd2   :  { %v233_v11 = vsel %vm115_vm0, %v231_v25, 0.0 }
  0xd3   :  { %234 = vadd.xlane.f32.xlu0 %v233_v11  ;;  %v236_v12 = vsel %vm115_vm0, %v232_v28, 0.0 }
  0xdb   :  { %237 = vadd.xlane.f32.xlu0 %v236_v12  ;;  %v316_v12 = vld [vmem:[%s777_s6] sm:$0xf]  ;;  %s656_s6 = smov [#allocation12]  }
  0xdc   :  { %v318_v29 = vperm.slane %v316_v12, 0  ;;  %v321_v30 = vperm.slane %v316_v12, 3  ;;  %s437_s28 = sshll.u32 %s656_s6, 4  ;;  %s438_s28 = int_to_ptr.vmem [resolvable:$true] %s437_s28 }
 0x146   :  { %v235_v35 = vpop.xlane.xlu0 %234 }
 0x147   :  { %v246_v36 = vmul.f32 %v245_v34, %v235_v35  ;;  %v320_v35 = vperm.slane %v316_v12, 2 }
 0x149   :  { %v740_v37 = vsub.f32 %v231_v25, %v246_v36 }
 0x14b   :  { %v250_v10 = vmul.f32 %v740_v37, %v740_v37 }
 0x14d   :  { %v252_v38 = vsel %vm115_vm0, %v250_v10, 0.0 }
 0x14e   :  { %253 = vadd.xlane.f32.xlu1 %v252_v38  ;;  %v238_v39 = vpop.xlane.xlu0 %237 }
 0x14f   :  { %v247_v40 = vmul.f32 %v245_v34, %v238_v39 }
 0x151   :  { %v745_v41 = vsub.f32 %v232_v28, %v247_v40 }
 0x153   :  { %v251_v42 = vmul.f32 %v745_v41, %v745_v41 }
 0x155   :  { %v255_v43 = vsel %vm115_vm0, %v251_v42, 0.0 }
 0x156   :  { %256 = vadd.xlane.f32.xlu1 %v255_v43 }
 0x1c1   :  { %v254_v47 = vpop.xlane.xlu1 %253 }
 0x1c2   :  { %v258_v49 = vmul.f32 %v254_v47, %v245_v34 }
 0x1c4   :  { %v260_v54 = vadd.f32 1e-05, %v258_v49 }
 0x1c6   :  { %490 = vrsqrt.f32 %v260_v54  ;;  %vm268_vm11 = vweird.f32 %v260_v54 }
 0x1c9   :  { %v257_v63 = vpop.xlane.xlu1 %256 }
 0x1ca   :  { %v259_v0 = vmul.f32 %v257_v63, %v245_v34  ;;  %v319_v34 = vperm.slane %v316_v12, 1 }
 0x1cc   :  { %v491_v1 = vpop.eup %490  ;;  %v261_v2 = vadd.f32 1e-05, %v259_v0 }
 0x1cd   :  { %v263_v3 = vmul.f32 %v491_v1, %v260_v54  ;;  %vm269_vm10 = vweird.f32 %v491_v1 }
 0x1ce   :  { %492 = vrsqrt.f32 %v261_v2  ;;  %vm270_vm12 = vmor %vm268_vm11, %vm269_vm10  ;;  %vm278_vm14 = vweird.f32 %v261_v2 }
 0x1cf   :  { %v264_v4 = vmul.f32 %v491_v1, %v263_v3 }
 0x1d1   :  { %v265_v5 = vmul.f32 0.5, %v264_v4 }
 0x1d3   :  { %v266_v6 = vsub.f32 1.5, %v265_v5 }
 0x1d4   :  { %v493_v7 = vpop.eup %492 }
 0x1d5   :  { %v267_v8 = vmul.f32 %v491_v1, %v266_v6  ;;  %v273_v13 = vmul.f32 %v493_v7, %v261_v2  ;;  %vm279_vm13 = vweird.f32 %v493_v7 }
 0x1d6   :  { %vm280_vm15 = vmor %vm278_vm14, %vm279_vm13 }
 0x1d7   :  { %v271_v15 = vsel %vm270_vm12, %v491_v1, %v267_v8  ;;  %v274_v16 = vmul.f32 %v493_v7, %v273_v13 }
 0x1d8   :  { %v282_v18 = vmul.f32 %v271_v15, %v740_v37 }
 0x1d9   :  { %v275_v19 = vmul.f32 0.5, %v274_v16 }
 0x1da   :  { %v288_v20 = vmul.f32 %v482_v14, %v282_v18 }
 0x1db   :  { %v276_v21 = vsub.f32 1.5, %v275_v19 }
 0x1dc   :  { %v294_v22 = vadd.f32 %v483_v17, %v288_v20 }
 0x1dd   :  { %v277_v23 = vmul.f32 %v493_v7, %v276_v21 }
 0x1de   :  { %296 = vst.msk [vmem:[#allocation2] sm:$0xff] %vm115_vm0, %v294_v22 }
 0x1df   :  { %v281_v24 = vsel %vm280_vm15, %v493_v7, %v277_v23 }
 0x1e0   :  { %v283_v25 = vmul.f32 %v281_v24, %v745_v41 }
 0x1e2   :  { %v289_v11 = vmul.f32 %v482_v14, %v283_v25 }
 0x1e4   :  { %v295_v26 = vadd.f32 %v483_v17, %v289_v11 }
 0x1e5   :  { %v298_v27 = vld [vmem:[#allocation2] sm:$0xff] }
 0x1e6   :  { %297 = vst.msk [vmem:[#allocation2 + $0x8] sm:$0xff] %vm115_vm0, %v295_v26  ;;  %458 = vmatmul.msk.f32.vlgmr.msrb.gmra.mxu1 %vm115_vm0, %v298_v27  ;;  %460 = vmatmul.msk.f32.vlgmr.msra.gmra.mxu2 %vm115_vm0, %v298_v27 }
 0x1e7   :  { %462 = vmatmul.msk.f32.vlgmr.msra.gmra.mxu3 %vm115_vm0, %v298_v27  ;;  %464 = vmatmul.msk.f32.vlgmr.msrb.gmra.mxu0 %vm115_vm0, %v298_v27 }
 0x1ed   :  { %v299_v28 = vld [vmem:[#allocation2 + $0x8] sm:$0xff] }
 0x1ee   :  { %459 = vmatmul.msk.f32.gmra.mxu1 %vm115_vm0, %v299_v28  ;;  %461 = vmatmul.msk.f32.gmra.mxu2 %vm115_vm0, %v299_v28 }
 0x1ef   :  { %463 = vmatmul.msk.f32.gmra.mxu3 %vm115_vm0, %v299_v28  ;;  %465 = vmatmul.msk.f32.gmra.mxu0 %vm115_vm0, %v299_v28 }
 0x263   :  { %v350_v31 = vpop.f32.mrf.mxu1 }
 0x264   :  { %v351_v32 = vadd.f32 %v350_v31, %v318_v29  ;;  %v419_v33 = vpop.f32.mrf.mxu0 }
 0x265   :  { %v420_v9 = vadd.f32 %v419_v33, %v321_v30 }
 0x266   :  { %425 = vst [vmem:[#allocation12] sm:$0xff] %v351_v32 }
 0x267   :  { %428 = vst [vmem:[#allocation12 + $0x18] sm:$0xff] %v420_v9 }
 0x269   :  { %v373_v36 = vpop.f32.mrf.mxu2 }
 0x26a   :  { %v374_v37 = vadd.f32 %v373_v36, %v319_v34  ;;  %v396_v10 = vpop.f32.mrf.mxu3 }
 0x26b   :  { %v397_v38 = vadd.f32 %v396_v10, %v320_v35  ;;  %v353_v39 = vpop.f32.mrf.mxu1 }
 0x26c   :  { %426 = vst [vmem:[#allocation12 + $0x8] sm:$0xff] %v374_v37  ;;  %v354_v40 = vadd.f32 %v353_v39, %v318_v29  ;;  %v422_v41 = vpop.f32.mrf.mxu0 }
 0x26d   :  { %427 = vst [vmem:[#allocation12 + $0x10] sm:$0xff] %v397_v38  ;;  %v423_v42 = vadd.f32 %v422_v41, %v321_v30 }
 0x26e   :  { %429 = vst [vmem:[#allocation12 + $0x20] sm:$0xff] %v354_v40 }
 0x26f   :  { %432 = vst [vmem:[#allocation12 + $0x38] sm:$0xff] %v423_v42 }
 0x271   :  { %v376_v43 = vpop.f32.mrf.mxu2 }
 0x272   :  { %v377_v44 = vadd.f32 %v376_v43, %v319_v34  ;;  %v399_v45 = vpop.f32.mrf.mxu3 }
 0x273   :  { %v400_v46 = vadd.f32 %v399_v45, %v320_v35 }
 0x274   :  { %430 = vst [vmem:[#allocation12 + $0x28] sm:$0xff] %v377_v44 }
 0x275   :  { %431 = vst [vmem:[#allocation12 + $0x30] sm:$0xff] %v400_v46 }
 0x276   :  { %445 = dma.vmem_to_hbm [thread:$0]  %s438_s28, 1024, %s440_s8, [#allocation5], %s653_s25, %s653_s25, %s654_s26  }
 0x277   :  { %644 = dma.done.wait [#allocation5], 1024  }
 0x278   :  { %645 = vsyncadd [#allocation5], 4294966272 }
 0x279   :  { %450 = vsyncpa [#allocation4], 1 }
 0x27a   :  { %451 = vsyncpa [#allocation7], 1 }
 0x27b   :  { %452 = vsyncpa [#allocation10], 1 }
 0x27c   :  { %453 = vsyncpa [#allocation5], 1 }

// kernel: tpu_custom_call.1
= control target key start
LH: loop header
LB: loop body
LE: loop exit
PB: predicated region body
PF: predicated region fallthrough
CT: control target
= control target key end

     0   :  { %12 = vsyncpa [#allocation4], 0  ;;  %s771_s0 = inlined_call_operand.hbm [shape: f32[16,32], index: 0, kind: input, shape index: {}]   ;;  %s772_s1 = inlined_call_operand.hbm [shape: f32[32,32], index: 1, kind: input, shape index: {}]   ;;  %s773_s2 = inlined_call_operand.vmem [shape: f32[1,32], index: 2, kind: input, shape index: {}]   ;;  %s774_s3 = inlined_call_operand.hbm [shape: f32[1,32], index: 3, kind: input, shape index: {}]   ;;  %s775_s4 = inlined_call_operand.hbm [shape: f32[1,32], index: 4, kind: input, shape index: {}]   ;;  %s776_s5 = inlined_call_operand.hbm [shape: f32[32,512], index: 5, kind: input, shape index: {}]   ;;  %s777_s6 = inlined_call_operand.vmem [shape: f32[1,512], index: 6, kind: input, shape index: {}]   ;;  %s778_s7 = inlined_call_operand.hbm [shape: f32[16,512], index: 7, kind: output, shape index: {}]  }
   0x1   :  { %13 = vsyncpa [#allocation7], 0 }
   0x2   :  { %14 = vsyncpa [#allocation10], 0 }
   0x3   :  { %15 = vsyncpa [#allocation5], 0  ;;  %s33_s26 = sshll.u32 %s772_s1, 4  ;;  %s646_s27 = smov [#allocation6]   ;;  %s34_s26 = int_to_ptr.hbm [resolvable:$true] %s33_s26 }
   0x4   :  { %s35_s28 = sshll.u32 %s646_s27, 4  ;;  %s60_s8 = sshll.u32 %s775_s4, 4  ;;  %s36_s28 = int_to_ptr.vmem [resolvable:$true] %s35_s28  ;;  %s61_s8 = int_to_ptr.hbm [resolvable:$true] %s60_s8 }
   0x5   :  { %s647_s9 = smov 128   ;;  %s648_s10 = smov 8  }
   0x6   :  { %41 = dma.hbm_to_vmem [thread:$0]  %s34_s26, 512, %s36_s28, [#allocation7], %s647_s9, %s647_s9, %s648_s10  }
   0x7   :  { %s649_s11 = smov [#allocation9]   ;;  %s20_s15 = sshll.u32 %s771_s0, 4  ;;  %s21_s15 = int_to_ptr.hbm [resolvable:$true] %s20_s15 }
   0x8   :  { %s62_s12 = sshll.u32 %s649_s11, 4  ;;  %s49_s17 = sshll.u32 %s774_s3, 4  ;;  %s63_s12 = int_to_ptr.vmem [resolvable:$true] %s62_s12  ;;  %s50_s17 = int_to_ptr.hbm [resolvable:$true] %s49_s17 }
   0x9   :  { %65 = dma.hbm_to_vmem [thread:$0]  %s61_s8, 16, %s63_s12, [#allocation10]  }
   0xa   :  { %s650_s18 = smov [#allocation3]   ;;  %s651_s4 = smov [#allocation8]  }
   0xb   :  { %s22_s19 = sshll.u32 %s650_s18, 4  ;;  %s51_s20 = sshll.u32 %s651_s4, 4  ;;  %s23_s19 = int_to_ptr.vmem [resolvable:$true] %s22_s19  ;;  %s52_s20 = int_to_ptr.vmem [resolvable:$true] %s51_s20 }
   0xc   :  { %28 = dma.hbm_to_vmem [thread:$0]  %s21_s15, 256, %s23_s19, [#allocation4], %s647_s9, %s647_s9, %s648_s10  }
   0xd   :  { %s70_s23 = sshll.u32 %s776_s5, 4  ;;  %s652_s0 = smov [#allocation11]   ;;  %s71_s23 = int_to_ptr.hbm [resolvable:$true] %s70_s23 }
   0xe   :  { %54 = dma.hbm_to_vmem [thread:$0]  %s50_s17, 16, %s52_s20, [#allocation7]  }
   0xf   :  { %s72_s24 = sshll.u32 %s652_s0, 4  ;;  %s653_s25 = smov 512   ;;  %s73_s24 = int_to_ptr.vmem [resolvable:$true] %s72_s24 }
  0x10   :  { %s654_s26 = smov 32  }
  0x11   :  { %78 = dma.hbm_to_vmem [thread:$0]  %s71_s23, 2048, %s73_s24, [#allocation10], %s653_s25, %s653_s25, %s654_s26  }
  0x12   :  { %638 = dma.done.wait [#allocation4], 256  }
  0x13   :  { %639 = vsyncadd [#allocation4], 4294967040 }
  0x14   :  { %640 = dma.done.wait [#allocation7], 528  }
  0x15   :  { %641 = vsyncadd [#allocation7], 4294966768 }
  0x16   :  { %642 = dma.done.wait [#allocation10], 2064  }
  0x17   :  { %643 = vsyncadd [#allocation10], 4294965232  ;;  %v110_v0 = vld [vmem:[#allocation6 + $0x18] sm:$0xff]  ;;  %v109_v1 = vld [vmem:[#allocation6 + $0x10] sm:$0xff]  ;;  %vm115_vm0 = vcmask 261120   ;;  %s439_s8 = sshll.u32 %s778_s7, 4  ;;  %s440_s8 = int_to_ptr.hbm [resolvable:$true] %s439_s8 }
  0x18   :  { %134 = vmatpush.msra.mxu0 %v110_v0  ;;  %466 = vmatpush.msra.mxu1 %v110_v0  ;;  %v108_v2 = vld [vmem:[#allocation6 + $0x8] sm:$0xff]  ;;  %v107_v3 = vld [vmem:[#allocation6] sm:$0xff]  ;;  %v105_v4 = vld [vmem:[#allocation3] sm:$0xff] }
  0x19   :  { %v106_v5 = vld [vmem:[#allocation3 + $0x8] sm:$0xff]  ;;  %v481_v6 = vld [vmem:[%s773_s2] ss:$0 sm:$0xff] }
  0x1a   :  { %135 = vmatpush.msra.mxu0 %v109_v1  ;;  %467 = vmatpush.msra.mxu1 %v109_v1 }
  0x1c   :  { %136 = vmatpush.msra.mxu0 %v108_v2  ;;  %468 = vmatpush.msra.mxu1 %v108_v2 }
  0x1e   :  { %137 = vmatpush.msra.mxu0 %v107_v3  ;;  %469 = vmatpush.msra.mxu1 %v107_v3 }
  0x1f   :  { %454 = vmatmul.msk.f32.vlgmr.msra.gmra.mxu0 %vm115_vm0, %v105_v4  ;;  %455 = vmatmul.msk.f32.vlgmr.msra.gmra.mxu1 %vm115_vm0, %v106_v5 }
  0x9c   :  { %v139_v7 = vpop.f32.mrf.mxu0  ;;  %v142_v8 = vpop.f32.mrf.mxu1 }
  0x9d   :  { %v720_v9 = vadd.f32 %v481_v6, %v139_v7  ;;  %v722_v10 = vadd.f32 %v481_v6, %v142_v8 }
  0x9f   :  { %v725_v11 = vmul.f32 0.70710677, %v720_v9  ;;  %v728_v12 = vmul.f32 0.70710677, %v722_v10 }
  0xa1   :  { %v149_v13 = vmul.f32 %v725_v11, %v725_v11  ;;  %v189_v14 = vmul.f32 %v728_v12, %v728_v12 }
  0xa3   :  { %v150_v15 = vmin.f32 %v149_v13, 16.0  ;;  %v190_v16 = vmin.f32 %v189_v14, 16.0 }
  0xa5   :  { %v151_v17 = vmul.f32 2.1237322e-06, %v150_v15  ;;  %v191_v18 = vmul.f32 2.1237322e-06, %v190_v16  ;;  %v162_v19 = vmul.f32 3.8918573e-05, %v150_v15 }
  0xa6   :  { %v202_v20 = vmul.f32 3.8918573e-05, %v190_v16 }
  0xa7   :  { %v152_v21 = vadd.f32 0.00028619796, %v151_v17  ;;  %v192_v22 = vadd.f32 0.00028619796, %v191_v18  ;;  %v163_v23 = vadd.f32 0.001143296, %v162_v19 }
  0xa8   :  { %v203_v24 = vadd.f32 0.001143296, %v202_v20 }
  0xa9   :  { %v153_v25 = vmul.f32 %v152_v21, %v150_v15  ;;  %v193_v26 = vmul.f32 %v192_v22, %v190_v16  ;;  %v164_v27 = vmul.f32 %v163_v23, %v150_v15  ;;  %v145_v22 = vmul.f32 0.5, %v720_v9 }
  0xaa   :  { %v204_v28 = vmul.f32 %v203_v24, %v190_v16 }
  0xab   :  { %v154_v29 = vadd.f32 0.0036580483, %v153_v25  ;;  %v165_v30 = vadd.f32 0.014752088, %v164_v27  ;;  %v194_v32 = vadd.f32 0.0036580483, %v193_v26 }
  0xac   :  { %v205_v31 = vadd.f32 0.014752088, %v204_v28  ;;  %v146_v27 = vmul.f32 0.5, %v722_v10 }
  0xad   :  { %v166_v33 = vmul.f32 %v165_v30, %v150_v15  ;;  %v155_v35 = vmul.f32 %v154_v29, %v150_v15  ;;  %v195_v38 = vmul.f32 %v194_v32, %v190_v16  ;;  %v655_v29 = vmov 32.0  }
  0xae   :  { %v206_v34 = vmul.f32 %v205_v31, %v190_v16 }
  0xaf   :  { %v167_v36 = vadd.f32 0.112945676, %v166_v33  ;;  %v156_v41 = vadd.f32 0.05243302, %v155_v35  ;;  %v196_v44 = vadd.f32 0.05243302, %v195_v38 }
  0xb0   :  { %v207_v37 = vadd.f32 0.112945676, %v206_v34 }
  0xb1   :  { %v168_v39 = vmul.f32 %v167_v36, %v150_v15  ;;  %v157_v47 = vmul.f32 %v156_v41, %v150_v15  ;;  %v197_v50 = vmul.f32 %v196_v44, %v190_v16  ;;  %v312_v44 = vld [vmem:[#allocation11 + $0x60] sm:$0xff] }
  0xb2   :  { %v208_v40 = vmul.f32 %v207_v37, %v190_v16  ;;  %345 = vmatpush.msrb.mxu1 %v312_v44 }
  0xb3   :  { %v169_v42 = vadd.f32 0.4994258, %v168_v39  ;;  %v158_v51 = vadd.f32 0.18741608, %v157_v47  ;;  %v198_v52 = vadd.f32 0.18741608, %v197_v50 }
  0xb4   :  { %v209_v43 = vadd.f32 0.4994258, %v208_v40  ;;  %v308_v50 = vld [vmem:[#allocation11 + $0x40] sm:$0xff] }
  0xb5   :  { %v170_v45 = vmul.f32 %v169_v42, %v150_v15  ;;  %v159_v54 = vmul.f32 %v158_v51, %v150_v15  ;;  %v199_v57 = vmul.f32 %v198_v52, %v190_v16  ;;  %v309_v51 = vld [vmem:[#allocation11 + $0x48] sm:$0xff]  ;;  %v310_v52 = vld [vmem:[#allocation11 + $0x50] sm:$0xff]  ;;  %346 = vmatpush.msrb.mxu1 %v308_v50 }
  0xb6   :  { %v210_v46 = vmul.f32 %v209_v43, %v190_v16 }
  0xb7   :  { %v171_v48 = vadd.f32 1.0, %v170_v45  ;;  %v160_v60 = vadd.f32 1.1283791, %v159_v54  ;;  %v200_v2 = vadd.f32 1.1283791, %v199_v57  ;;  %v313_v45 = vld [vmem:[#allocation11 + $0x68] sm:$0xff] }
  0xb8   :  { %v211_v49 = vadd.f32 1.0, %v210_v46  ;;  %v314_v46 = vld [vmem:[#allocation11 + $0x70] sm:$0xff]  ;;  %368 = vmatpush.msra.mxu2 %v313_v45 }
  0xb9   :  { %484 = vrcp.f32 %v171_v48  ;;  %v183_v61 = vand.u32 2147483648, %v171_v48  ;;  %v181_v0 = vand.u32 2147483647, %v171_v48  ;;  %vm177_vm3 = vweird.f32 %v171_v48  ;;  %391 = vmatpush.msra.mxu3 %v314_v46  ;;  %v306_v57 = vld [vmem:[#allocation11 + $0x30] sm:$0xff] }
  0xba   :  { %486 = vrcp.f32 %v211_v49  ;;  %v223_v1 = vand.u32 2147483648, %v211_v49  ;;  %v221_v4 = vand.u32 2147483647, %v211_v49  ;;  %vm217_vm5 = vweird.f32 %v211_v49  ;;  %369 = vmatpush.msra.mxu2 %v309_v51 }
  0xbb   :  { %v184_v6 = vor.u32 1.1754944e-38, %v183_v61  ;;  %v161_v8 = vmul.f32 %v160_v60, %v725_v11  ;;  %vm182_vm6 = vcmp.eq.f32.partialorder %v181_v0, 8.507059e+37  ;;  %v201_v15 = vmul.f32 %v200_v2, %v728_v12  ;;  %392 = vmatpush.msra.mxu3 %v310_v52  ;;  %v301_v60 = vld [vmem:[#allocation11 + $0x8] sm:$0xff]  ;;  %v302_v61 = vld [vmem:[#allocation11 + $0x10] sm:$0xff] }
  0xbc   :  { %v224_v14 = vor.u32 1.1754944e-38, %v223_v1  ;;  %vm222_vm8 = vcmp.eq.f32.partialorder %v221_v4, 8.507059e+37  ;;  %488 = vrcp.f32 %v655_v29 }
  0xbd   :  { %393 = vmatpush.msra.mxu3 %v306_v57 }
  0xbf   :  { %v485_v53 = vpop.eup %484  ;;  %394 = vmatpush.msra.mxu3 %v302_v61 }
  0xc0   :  { %v487_v55 = vpop.eup %486  ;;  %v173_v56 = vmul.f32 %v485_v53, %v171_v48  ;;  %vm178_vm1 = vweird.f32 %v485_v53  ;;  %v315_v48 = vld [vmem:[#allocation11 + $0x78] sm:$0xff] }
  0xc1   :  { %v213_v58 = vmul.f32 %v487_v55, %v211_v49  ;;  %vm218_vm2 = vweird.f32 %v487_v55  ;;  %vm179_vm4 = vmor %vm177_vm3, %vm178_vm1  ;;  %414 = vmatpush.msrb.mxu0 %v315_v48 }
  0xc2   :  { %v174_v59 = vsub.f32 1.0, %v173_v56  ;;  %vm219_vm7 = vmor %vm217_vm5, %vm218_vm2  ;;  %v489_v30 = vpop.eup %488  ;;  %v305_v56 = vld [vmem:[#allocation11 + $0x28] sm:$0xff] }
  0xc3   :  { %v214_v62 = vsub.f32 1.0, %v213_v58  ;;  %v240_v31 = vmul.f32 32.0, %v489_v30  ;;  %vm244_vm9 = vweird.f32 %v489_v30  ;;  %370 = vmatpush.msra.mxu2 %v305_v56  ;;  %v307_v58 = vld [vmem:[#allocation11 + $0x38] sm:$0xff] }
  0xc4   :  { %v175_v63 = vmul.f32 %v485_v53, %v174_v59  ;;  %v300_v59 = vld [vmem:[#allocation11] sm:$0xff] }
  0xc5   :  { %v215_v3 = vmul.f32 %v487_v55, %v214_v62  ;;  %v241_v32 = vsub.f32 1.0, %v240_v31  ;;  %371 = vmatpush.msra.mxu2 %v301_v60  ;;  %v303_v62 = vld [vmem:[#allocation11 + $0x18] sm:$0xff] }
  0xc6   :  { %v176_v5 = vadd.f32 %v485_v53, %v175_v63 }
  0xc7   :  { %v216_v7 = vadd.f32 %v487_v55, %v215_v3  ;;  %v242_v33 = vmul.f32 %v489_v30, %v241_v32 }
  0xc8   :  { %v180_v13 = vsel %vm179_vm4, %v485_v53, %v176_v5  ;;  %v311_v53 = vld [vmem:[#allocation11 + $0x58] sm:$0xff] }
  0xc9   :  { %v185_v16 = vsel %vm182_vm6, %v184_v6, %v180_v13  ;;  %v220_v17 = vsel %vm219_vm7, %v487_v55, %v216_v7  ;;  %v243_v9 = vadd.f32 %v489_v30, %v242_v33  ;;  %415 = vmatpush.msrb.mxu0 %v311_v53  ;;  %v304_v55 = vld [vmem:[#allocation11 + $0x20] sm:$0xff] }
  0xca   :  { %v186_v18 = vmul.f32 %v185_v16, %v161_v8  ;;  %v225_v19 = vsel %vm222_vm8, %v224_v14, %v220_v17  ;;  %347 = vmatpush.msrb.mxu1 %v304_v55  ;;  %v482_v14 = vld [vmem:[#allocation8] ss:$0 sm:$0xff]  ;;  %v483_v17 = vld [vmem:[#allocation9] ss:$0 sm:$0xff] }
  0xcb   :  { %v226_v20 = vmul.f32 %v225_v19, %v201_v15  ;;  %v245_v34 = vsel %vm244_vm9, %v489_v30, %v243_v9  ;;  %416 = vmatpush.msrb.mxu0 %v307_v58 }
  0xcc   :  { %v456_v21 = vclamps-f32 %v186_v18, 1.0  ;;  %348 = vmatpush.msrb.mxu1 %v300_v59 }
  0xcd   :  { %v457_v24 = vclamps-f32 %v226_v20, 1.0  ;;  %417 = vmatpush.msrb.mxu0 %v303_v62 }
  0xce   :  { %v229_v23 = vadd.f32 1.0, %v456_v21 }
  0xcf   :  { %v230_v26 = vadd.f32 1.0, %v457_v24 }
  0xd0   :  { %v231_v25 = vmul.f32 %v229_v23, %v145_v22 }
  0xd1   :  { %v232_v28 = vmul.f32 %v230_v26, %v146_v27 }
  0xd2   :  { %v233_v11 = vsel %vm115_vm0, %v231_v25, 0.0 }
  0xd3   :  { %234 = vadd.xlane.f32.xlu0 %v233_v11  ;;  %v236_v12 = vsel %vm115_vm0, %v232_v28, 0.0 }
  0xdb   :  { %237 = vadd.xlane.f32.xlu0 %v236_v12  ;;  %v316_v12 = vld [vmem:[%s777_s6] sm:$0xf]  ;;  %s656_s6 = smov [#allocation12]  }
  0xdc   :  { %v318_v29 = vperm.slane %v316_v12, 0  ;;  %v321_v30 = vperm.slane %v316_v12, 3  ;;  %s437_s28 = sshll.u32 %s656_s6, 4  ;;  %s438_s28 = int_to_ptr.vmem [resolvable:$true] %s437_s28 }
 0x146   :  { %v235_v35 = vpop.xlane.xlu0 %234 }
 0x147   :  { %v246_v36 = vmul.f32 %v245_v34, %v235_v35  ;;  %v320_v35 = vperm.slane %v316_v12, 2 }
 0x149   :  { %v740_v37 = vsub.f32 %v231_v25, %v246_v36 }
 0x14b   :  { %v250_v10 = vmul.f32 %v740_v37, %v740_v37 }
 0x14d   :  { %v252_v38 = vsel %vm115_vm0, %v250_v10, 0.0 }
 0x14e   :  { %253 = vadd.xlane.f32.xlu1 %v252_v38  ;;  %v238_v39 = vpop.xlane.xlu0 %237 }
 0x14f   :  { %v247_v40 = vmul.f32 %v245_v34, %v238_v39 }
 0x151   :  { %v745_v41 = vsub.f32 %v232_v28, %v247_v40 }
 0x153   :  { %v251_v42 = vmul.f32 %v745_v41, %v745_v41 }
 0x155   :  { %v255_v43 = vsel %vm115_vm0, %v251_v42, 0.0 }
 0x156   :  { %256 = vadd.xlane.f32.xlu1 %v255_v43 }
 0x1c1   :  { %v254_v47 = vpop.xlane.xlu1 %253 }
 0x1c2   :  { %v258_v49 = vmul.f32 %v254_v47, %v245_v34 }
 0x1c4   :  { %v260_v54 = vadd.f32 1e-05, %v258_v49 }
 0x1c6   :  { %490 = vrsqrt.f32 %v260_v54  ;;  %vm268_vm11 = vweird.f32 %v260_v54 }
 0x1c9   :  { %v257_v63 = vpop.xlane.xlu1 %256 }
 0x1ca   :  { %v259_v0 = vmul.f32 %v257_v63, %v245_v34  ;;  %v319_v34 = vperm.slane %v316_v12, 1 }
 0x1cc   :  { %v491_v1 = vpop.eup %490  ;;  %v261_v2 = vadd.f32 1e-05, %v259_v0 }
 0x1cd   :  { %v263_v3 = vmul.f32 %v491_v1, %v260_v54  ;;  %vm269_vm10 = vweird.f32 %v491_v1 }
 0x1ce   :  { %492 = vrsqrt.f32 %v261_v2  ;;  %vm270_vm12 = vmor %vm268_vm11, %vm269_vm10  ;;  %vm278_vm14 = vweird.f32 %v261_v2 }
 0x1cf   :  { %v264_v4 = vmul.f32 %v491_v1, %v263_v3 }
 0x1d1   :  { %v265_v5 = vmul.f32 0.5, %v264_v4 }
 0x1d3   :  { %v266_v6 = vsub.f32 1.5, %v265_v5 }
 0x1d4   :  { %v493_v7 = vpop.eup %492 }
 0x1d5   :  { %v267_v8 = vmul.f32 %v491_v1, %v266_v6  ;;  %v273_v13 = vmul.f32 %v493_v7, %v261_v2  ;;  %vm279_vm13 = vweird.f32 %v493_v7 }
 0x1d6   :  { %vm280_vm15 = vmor %vm278_vm14, %vm279_vm13 }
 0x1d7   :  { %v271_v15 = vsel %vm270_vm12, %v491_v1, %v267_v8  ;;  %v274_v16 = vmul.f32 %v493_v7, %v273_v13 }
 0x1d8   :  { %v282_v18 = vmul.f32 %v271_v15, %v740_v37 }
 0x1d9   :  { %v275_v19 = vmul.f32 0.5, %v274_v16 }
 0x1da   :  { %v288_v20 = vmul.f32 %v482_v14, %v282_v18 }
 0x1db   :  { %v276_v21 = vsub.f32 1.5, %v275_v19 }
 0x1dc   :  { %v294_v22 = vadd.f32 %v483_v17, %v288_v20 }
 0x1dd   :  { %v277_v23 = vmul.f32 %v493_v7, %v276_v21 }
 0x1de   :  { %296 = vst.msk [vmem:[#allocation2] sm:$0xff] %vm115_vm0, %v294_v22 }
 0x1df   :  { %v281_v24 = vsel %vm280_vm15, %v493_v7, %v277_v23 }
 0x1e0   :  { %v283_v25 = vmul.f32 %v281_v24, %v745_v41 }
 0x1e2   :  { %v289_v11 = vmul.f32 %v482_v14, %v283_v25 }
 0x1e4   :  { %v295_v26 = vadd.f32 %v483_v17, %v289_v11 }
 0x1e5   :  { %v298_v27 = vld [vmem:[#allocation2] sm:$0xff] }
 0x1e6   :  { %297 = vst.msk [vmem:[#allocation2 + $0x8] sm:$0xff] %vm115_vm0, %v295_v26  ;;  %458 = vmatmul.msk.f32.vlgmr.msrb.gmra.mxu1 %vm115_vm0, %v298_v27  ;;  %460 = vmatmul.msk.f32.vlgmr.msra.gmra.mxu2 %vm115_vm0, %v298_v27 }
 0x1e7   :  { %462 = vmatmul.msk.f32.vlgmr.msra.gmra.mxu3 %vm115_vm0, %v298_v27  ;;  %464 = vmatmul.msk.f32.vlgmr.msrb.gmra.mxu0 %vm115_vm0, %v298_v27 }
 0x1ed   :  { %v299_v28 = vld [vmem:[#allocation2 + $0x8] sm:$0xff] }
 0x1ee   :  { %459 = vmatmul.msk.f32.gmra.mxu1 %vm115_vm0, %v299_v28  ;;  %461 = vmatmul.msk.f32.gmra.mxu2 %vm115_vm0, %v299_v28 }
 0x1ef   :  { %463 = vmatmul.msk.f32.gmra.mxu3 %vm115_vm0, %v299_v28  ;;  %465 = vmatmul.msk.f32.gmra.mxu0 %vm115_vm0, %v299_v28 }
 0x263   :  { %v350_v31 = vpop.f32.mrf.mxu1 }
 0x264   :  { %v351_v32 = vadd.f32 %v350_v31, %v318_v29  ;;  %v419_v33 = vpop.f32.mrf.mxu0 }
 0x265   :  { %v420_v9 = vadd.f32 %v419_v33, %v321_v30 }
 0x266   :  { %425 = vst [vmem:[#allocation12] sm:$0xff] %v351_v32 }
 0x267   :  { %428 = vst [vmem:[#allocation12 + $0x18] sm:$0xff] %v420_v9 }
 0x269   :  { %v373_v36 = vpop.f32.mrf.mxu2 }
 0x26a   :  { %v374_v37 = vadd.f32 %v373_v36, %v319_v34  ;;  %v396_v10 = vpop.f32.mrf.mxu3 }
 0x26b   :  { %v397_v38 = vadd.f32 %v396_v10, %v320_v35  ;;  %v353_v39 = vpop.f32.mrf.mxu1 }
 0x26c   :  { %426 = vst [vmem:[#allocation12 + $0x8] sm:$0xff] %v374_v37  ;;  %v354_v40 = vadd.f32 %v353_v39, %v318_v29  ;;  %v422_v41 = vpop.f32.mrf.mxu0 }
 0x26d   :  { %427 = vst [vmem:[#allocation12 + $0x10] sm:$0xff] %v397_v38  ;;  %v423_v42 = vadd.f32 %v422_v41, %v321_v30 }
 0x26e   :  { %429 = vst [vmem:[#allocation12 + $0x20] sm:$0xff] %v354_v40 }
 0x26f   :  { %432 = vst [vmem:[#allocation12 + $0x38] sm:$0xff] %v423_v42 }
 0x271   :  { %v376_v43 = vpop.f32.mrf.mxu2 }
 0x272   :  { %v377_v44 = vadd.f32 %v376_v43, %v319_v34  ;;  %v399_v45 = vpop.f32.mrf.mxu3 }
 0x273   :  { %v400_v46 = vadd.f32 %v399_v45, %v320_v35 }
 0x274   :  { %430 = vst [vmem:[#allocation12 + $0x28] sm:$0xff] %v377_v44 }
 0x275   :  { %431 = vst [vmem:[#allocation12 + $0x30] sm:$0xff] %v400_v46 }
 0x276   :  { %445 = dma.vmem_to_hbm [thread:$0]  %s438_s28, 1024, %s440_s8, [#allocation5], %s653_s25, %s653_s25, %s654_s26  }
 0x277   :  { %644 = dma.done.wait [#allocation5], 1024  }
 0x278   :  { %645 = vsyncadd [#allocation5], 4294966272 }
 0x279   :  { %450 = vsyncpa [#allocation4], 1 }
 0x27a   :  { %451 = vsyncpa [#allocation7], 1 }
 0x27b   :  { %452 = vsyncpa [#allocation10], 1 }
 0x27c   :  { %453 = vsyncpa [#allocation5], 1 }

</bundles_post_ra>
